<compile_context>
chip_gen: v7x
topology: tpu7x:2x2x1
jax: 0.10.0
libtpu: 0.0.40
codegen_flags: <defaults>
</compile_context>

<pallas_src>
import functools
import math

import jax
import jax.numpy as jnp
from jax import lax
from jax.experimental import pallas as pl
from jax.experimental.pallas import tpu as pltpu


def _round_up(x: int, m: int) -> int:
    return (x + m - 1) // m * m


def _tpu_generation():
    """Generation-aware constants (MXU rate, HBM BW, MXU tile, VMEM budgets)."""
    kind = ""
    try:
        kind = jax.devices()[0].device_kind.lower()
    except Exception:
        pass
    if "v5 lite" in kind or "v5e" in kind or "v5lite" in kind:
        return dict(mxu_flops=197e12, hbm_bw=0.82e12, mxu_tile=128,
                    vmem_cap=96 << 20, table_cap=24 << 20)
    if "v6" in kind:
        return dict(mxu_flops=918e12, hbm_bw=1.40e12, mxu_tile=256,
                    vmem_cap=96 << 20, table_cap=24 << 20)
    if "v7" in kind:
        # v7x: 64 MiB VMEM per TensorCore (2 TCs) -> budget per core.
        return dict(mxu_flops=996e12, hbm_bw=3.20e12, mxu_tile=256,
                    vmem_cap=48 << 20, table_cap=8 << 20)
    # Unknown generation: conservative budgets.
    return dict(mxu_flops=197e12, hbm_bw=0.80e12, mxu_tile=128,
                vmem_cap=48 << 20, table_cap=8 << 20)


def _vmem_limit_bytes(est: int, gen) -> int:
    return int(min(gen["vmem_cap"], max(int(1.5 * est) + (2 << 20), 32 << 20)))


# ---------------------------------------------------------------------------
# Fast path: table resident (single-buffered) in VMEM, one-hot MXU gather.
# ---------------------------------------------------------------------------
def _vmem_table_kernel(ids_ref, table_ref, out_ref, *, scale, use_highest):
    # ids_ref  : (TM, 1) int32 block of token ids (VMEM)
    # table_ref: (V, D) full embedding table, resident across the grid (VMEM)
    # out_ref  : (TM, D) output block (sublane/lane dense)
    tm = ids_ref.shape[0]
    v = table_ref.shape[0]
    ids = ids_ref[...]                                          # (TM, 1)
    iota_v = lax.broadcasted_iota(jnp.int32, (tm, v), 1)        # (TM, V)
    one_hot = (ids == iota_v).astype(table_ref.dtype)           # (TM, V)
    gathered = jnp.dot(
        one_hot,
        table_ref[...],
        preferred_element_type=jnp.float32,
        # HIGHEST is only needed for exact row selection from f32 tables;
        # bf16 x bf16 is already exact in a single MXU pass.
        precision=lax.Precision.HIGHEST if use_highest else None,
    )                                                           # (TM, D) f32
    out_ref[...] = (gathered * scale).astype(out_ref.dtype)


# ---------------------------------------------------------------------------
# Large-table path: table stays in HBM; row DMAs land directly in out_ref.
# ---------------------------------------------------------------------------
def _hbm_gather_kernel(ids_ref, table_hbm, out_ref, sems, *,
                       block_tokens, dma_queue, scale):
    # ids_ref  : (n_blocks, TM) int32 token ids, scalar-prefetched into SMEM
    # table_hbm: (V, D) embedding table left in HBM (memory_space=pl.ANY)
    # out_ref  : (TM, D) output block (VMEM) -- also the DMA landing buffer
    # sems     : (Q,) DMA semaphores -> Q row copies kept in flight
    blk = pl.program_id(0)

    def start_row(t, row_id, slot):
        pltpu.make_async_copy(
            table_hbm.at[pl.ds(row_id, 1), :],
            out_ref.at[pl.ds(t, 1), :],
            sems.at[slot],
        ).start()

    # Prime the DMA ring with the first Q row gathers.
    def prime(t, carry):
        start_row(t, ids_ref[blk, t], t)
        return carry

    lax.fori_loop(0, dma_queue, prime, 0, unroll=True)

    # For each row: wait for its copy, immediately refill the ring slot.
    def consume(t, carry):
        slot = t & (dma_queue - 1)
        nxt = t + dma_queue
        # Read the next row id from SMEM *before* the wait: a DMA wait breaks
        # SMEM store->load forwarding, so a read issued after it would stall.
        next_id = ids_ref[blk, jnp.minimum(nxt, block_tokens - 1)]
        # Wait on the landed row; only copy size + semaphore matter for the
        # wait, so constant src/dst slices avoid any dynamic address math here.
        pltpu.make_async_copy(
            table_hbm.at[pl.ds(0, 1), :],
            out_ref.at[pl.ds(0, 1), :],
            sems.at[slot],
        ).wait()

        @pl.when(nxt < block_tokens)
        def _():
            start_row(nxt, next_id, slot)

        return carry

    lax.fori_loop(0, block_tokens, consume, 0, unroll=8)

    # One dense, full-vreg scaled pass over the whole (TM, D) block.
    out_ref[...] = (out_ref[...].astype(jnp.float32) * scale).astype(out_ref.dtype)


# ---------------------------------------------------------------------------
# Wrapper
# ---------------------------------------------------------------------------
def input_embeddings_pallas(ids: jax.Array,
                            emb_table: jax.Array,
                            *,
                            block_tokens: int = 256,
                            dma_queue: int = 16,
                            max_onehot_vocab: int | None = None,
                            max_vmem_table_bytes: int | None = None,
                            force_hbm_gather: bool = False) -> jax.Array:
    """ids: (B, S) int32, emb_table: (V, D) -> (B, S, D) in emb_table.dtype."""
    B, S = ids.shape
    V, D = emb_table.shape
    n_tokens = B * S
    scale = math.sqrt(D)  # sqrt(d_model), compile-time constant
    dtype = emb_table.dtype
    itemsize = jnp.dtype(dtype).itemsize
    gen = _tpu_generation()

    # TODO(synk): PyTorch nn.Embedding raises on out-of-range ids; here they
    # are clamped to [0, V-1] (no clean way to raise from inside a TPU kernel).
    flat_ids = jnp.clip(ids.reshape(-1).astype(jnp.int32), 0, V - 1)

    # ---- path selection: cost / dtype / generation aware -------------------
    use_highest = itemsize >= 4  # exact row selection needs HIGHEST only for f32
    if max_vmem_table_bytes is None:
        max_vmem_table_bytes = gen["table_cap"]
    if max_onehot_vocab is None:
        max_onehot_vocab = 1024 if use_highest else 2048
        if gen["mxu_flops"] < 400e12:   # v5e-class MXU: cap the one-hot path lower
            max_onehot_vocab //= 2

    q_est = 1 << (max(1, min(dma_queue, 512)).bit_length() - 1)
    table_bytes = V * D * itemsize
    mxu_passes = 3 if use_highest else 1
    onehot_s_per_tok = 2.0 * V * D * mxu_passes / gen["mxu_flops"]
    dma_latency_s = 1e-6
    gather_s_per_tok = max(D * itemsize / gen["hbm_bw"], dma_latency_s / q_est)

    use_vmem_table = (
        (not force_hbm_gather)
        and table_bytes <= max_vmem_table_bytes
        and V <= max_onehot_vocab
        and onehot_s_per_tok <= gather_s_per_tok
    )

    # ---- token-block size ---------------------------------------------------
    # Fast path: full-height MXU tiles (256 on v6e/v7x, 128 on v5e) when there
    # is enough work; otherwise just sublane-dense (multiple of 8).
    align = gen["mxu_tile"] if (use_vmem_table and n_tokens >= gen["mxu_tile"]) else 8
    tm = max(align, _round_up(min(block_tokens, n_tokens), align))
    # Keep >= 2 grid blocks when there is enough work so the single "parallel"
    # axis can actually split across both TensorCores on v7x.
    if n_tokens >= 2 * align:
        tm = min(tm, _round_up(-(-n_tokens // 2), align))
    n_padded = _round_up(n_tokens, tm)
    n_blocks = n_padded // tm

    if n_padded != n_tokens:
        # Pad with id 0 (a valid row); padded rows are sliced off afterwards.
        flat_ids = jnp.pad(flat_ids, (0, n_padded - n_tokens))

    out_shape = jax.ShapeDtypeStruct((n_padded, D), dtype)

    if use_vmem_table:
        ids_col = flat_ids.reshape(n_padded, 1)
        # VMEM estimate: table once (single-buffered), ids/out double-buffered,
        # plus the one-hot and f32-accumulator temporaries.
        est_1buf = (table_bytes + 2 * tm * 4 + 2 * tm * D * itemsize
                    + tm * V * itemsize + tm * D * 4)

        def _call_fast(table_spec, est):
            return pl.pallas_call(
                functools.partial(_vmem_table_kernel, scale=scale,
                                  use_highest=use_highest),
                out_shape=out_shape,
                grid=(n_blocks,),
                in_specs=[
                    pl.BlockSpec((tm, 1), lambda i: (i, 0)),   # ids block
                    table_spec,                                # resident table
                ],
                out_specs=pl.BlockSpec((tm, D), lambda i: (i, 0)),
                compiler_params=pltpu.CompilerParams(
                    dimension_semantics=("parallel",),
                    vmem_limit_bytes=_vmem_limit_bytes(est, gen)),
            )(ids_col, emb_table)

        try:
            # Single-buffer the resident table: constant index_map => fetched
            # exactly once, so double buffering would only burn VMEM.
            out_flat = _call_fast(
                pl.BlockSpec((V, D), lambda i: (0, 0),
                             pipeline_mode=pl.Buffered(1)),
                est_1buf)
        except Exception:
            # Compatibility guard for JAX builds without per-operand
            # pipeline_mode: fall back to default (double) buffering and
            # account for the second table copy in the VMEM limit.
            out_flat = _call_fast(
                pl.BlockSpec((V, D), lambda i: (0, 0)),
                est_1buf + table_bytes)
    else:
        q = max(1, min(dma_queue, tm))
        q = 1 << (q.bit_length() - 1)          # power-of-two semaphore ring
        ids_blocked = flat_ids.reshape(n_blocks, tm)   # 2-D SMEM: linear padding
        est = 2 * tm * D * itemsize + (1 << 20)
        out_flat = pl.pallas_call(
            functools.partial(_hbm_gather_kernel,
                              block_tokens=tm, dma_queue=q, scale=scale),
            out_shape=out_shape,
            grid_spec=pltpu.PrefetchScalarGridSpec(
                num_scalar_prefetch=1,
                grid=(n_blocks,),
                in_specs=[pl.BlockSpec(memory_space=pl.ANY)],  # table in HBM
                out_specs=pl.BlockSpec((tm, D), lambda i, ids: (i, 0)),
                scratch_shapes=[pltpu.SemaphoreType.DMA((q,))],
            ),
            compiler_params=pltpu.CompilerParams(
                dimension_semantics=("parallel",),
                vmem_limit_bytes=_vmem_limit_bytes(est, gen)),
        )(ids_blocked, emb_table)

    if n_padded != n_tokens:
        out_flat = out_flat[:n_tokens]
    return out_flat.reshape(B, S, D)


if __name__ == "__main__":
    # Small deterministic example consistent with the module.
    d_model = 128
    vocab_size = 64
    batch, seq = 2, 9  # 18 tokens -> exercises blocking + tail padding

    key = jax.random.PRNGKey(0)
    k_emb, k_ids = jax.random.split(key)

    # nn.Embedding default init: weights ~ N(0, 1)
    emb_table = jax.random.normal(k_emb, (vocab_size, d_model), dtype=jnp.float32)
    ids = jax.random.randint(k_ids, (batch, seq), 0, vocab_size, dtype=jnp.int32)

    ref = emb_table[ids] * math.sqrt(d_model)

    # Fast path: table resident (single-buffered) in VMEM, one-hot MXU gather.
    out = input_embeddings_pallas(ids, emb_table, block_tokens=8)
    out = jax.block_until_ready(out)
    assert out.shape == (batch, seq, d_model)
    assert out.dtype == jnp.float32
    assert jnp.allclose(out, ref, atol=1e-5, rtol=1e-5)

    # Large-table path (forced here on the small table): table stays in HBM,
    # row DMAs land directly in the pipelined output block.
    out_hbm = input_embeddings_pallas(
        ids, emb_table, block_tokens=8, dma_queue=4, force_hbm_gather=True)
    out_hbm = jax.block_until_ready(out_hbm)
    assert jnp.allclose(out_hbm, ref, atol=1e-5, rtol=1e-5)

    print("KERNEL_OK")
</pallas_src>

<mosaic_0001>
module attributes {stable_mosaic.version = 11 : i64} {
  func.func @_vmem_table_kernel(%arg0: i32, %arg1: memref<8x1xi32, #tpu.memory_space<vmem>>, %arg2: memref<64x128xf32, #tpu.memory_space<vmem>>, %arg3: memref<8x128xf32, #tpu.memory_space<vmem>>) attributes {dimension_semantics = [#tpu.dimension_semantics<parallel>], iteration_bounds = array<i64: 3>, scalar_prefetch = 0 : i64, scratch_operands = 0 : i64, tpu.core_type = #tpu.core_type<tc>, window_params = [{transform_indices = @transform_0, window_bounds = array<i64: 8, 1>}, {pipeline_mode = #tpu.pipeline_mode<synchronous>, transform_indices = @transform_1, window_bounds = array<i64: 64, 128>}, {transform_indices = @transform_2, window_bounds = array<i64: 8, 128>}]} {
    %c0 = arith.constant 0 : index
    %c0_0 = arith.constant 0 : index
    %0 = vector.load %arg1[%c0, %c0_0] : memref<8x1xi32, #tpu.memory_space<vmem>>, vector<8x1xi32>
    %1 = tpu.iota {dimensions = array<i32: 1>} : vector<8x64xi32>
    %2 = vector.broadcast %0 : vector<8x1xi32> to vector<8x64xi32>
    %3 = arith.cmpi eq, %2, %1 : vector<8x64xi32>
    %4 = arith.extui %3 : vector<8x64xi1> to vector<8x64xi32>
    %5 = arith.sitofp %4 : vector<8x64xi32> to vector<8x64xf32>
    %c0_1 = arith.constant 0 : index
    %c0_2 = arith.constant 0 : index
    %6 = vector.load %arg2[%c0_1, %c0_2] : memref<64x128xf32, #tpu.memory_space<vmem>>, vector<64x128xf32>
    %cst = arith.constant dense<0.000000e+00> : vector<8x128xf32>
    %7 = tpu.matmul %5, %6, %cst {dimension_numbers = #tpu.dot_dimension_numbers<[1], [0], [0], [1], [0, 0, 1, 1], [], []>, precision = #tpu.contract_precision<fp32>} : vector<8x64xf32>, vector<64x128xf32>, vector<8x128xf32> -> vector<8x128xf32>
    %cst_3 = arith.constant 11.3137083 : f32
    %8 = vector.broadcast %cst_3 : f32 to vector<8x128xf32>
    %9 = arith.mulf %7, %8 : vector<8x128xf32>
    %c0_4 = arith.constant 0 : index
    %c0_5 = arith.constant 0 : index
    %10 = vector.load %arg3[%c0_4, %c0_5] : memref<8x128xf32, #tpu.memory_space<vmem>>, vector<8x128xf32>
    tpu.vector_store %arg3[%c0_4, %c0_5], %9 {strides = array<i32>} : memref<8x128xf32, #tpu.memory_space<vmem>>, vector<8x128xf32>,
    return
  }
  func.func @transform_0(%arg0: i32) -> (i32, i32) {
    %c0_i32 = arith.constant 0 : i32
    %c0_i32_0 = arith.constant 0 : i32
    return %arg0, %c0_i32 : i32, i32
  }
  func.func @transform_1(%arg0: i32) -> (i32, i32) {
    %c0_i32 = arith.constant 0 : i32
    %c0_i32_0 = arith.constant 0 : i32
    %c0_i32_1 = arith.constant 0 : i32
    return %c0_i32, %c0_i32_0 : i32, i32
  }
  func.func @transform_2(%arg0: i32) -> (i32, i32) {
    %c0_i32 = arith.constant 0 : i32
    %c0_i32_0 = arith.constant 0 : i32
    return %arg0, %c0_i32 : i32, i32
  }
}

module attributes {stable_mosaic.version = 11 : i64} {
  func.func @_vmem_table_kernel(%arg0: i32, %arg1: memref<8x1xi32, #tpu.memory_space<vmem>>, %arg2: memref<64x128xf32, #tpu.memory_space<vmem>>, %arg3: memref<8x128xf32, #tpu.memory_space<vmem>>) attributes {dimension_semantics = [#tpu.dimension_semantics<parallel>], iteration_bounds = array<i64: 3>, scalar_prefetch = 0 : i64, scratch_operands = 0 : i64, tpu.core_type = #tpu.core_type<tc>, window_params = [{transform_indices = @transform_0, window_bounds = array<i64: 8, 1>}, {pipeline_mode = #tpu.pipeline_mode<synchronous>, transform_indices = @transform_1, window_bounds = array<i64: 64, 128>}, {transform_indices = @transform_2, window_bounds = array<i64: 8, 128>}]} {
    %c0 = arith.constant 0 : index
    %c0_0 = arith.constant 0 : index
    %0 = vector.load %arg1[%c0, %c0_0] : memref<8x1xi32, #tpu.memory_space<vmem>>, vector<8x1xi32>
    %1 = tpu.iota {dimensions = array<i32: 1>} : vector<8x64xi32>
    %2 = vector.broadcast %0 : vector<8x1xi32> to vector<8x64xi32>
    %3 = arith.cmpi eq, %2, %1 : vector<8x64xi32>
    %4 = arith.extui %3 : vector<8x64xi1> to vector<8x64xi32>
    %5 = arith.sitofp %4 : vector<8x64xi32> to vector<8x64xf32>
    %c0_1 = arith.constant 0 : index
    %c0_2 = arith.constant 0 : index
    %6 = vector.load %arg2[%c0_1, %c0_2] : memref<64x128xf32, #tpu.memory_space<vmem>>, vector<64x128xf32>
    %cst = arith.constant dense<0.000000e+00> : vector<8x128xf32>
    %7 = tpu.matmul %5, %6, %cst {dimension_numbers = #tpu.dot_dimension_numbers<[1], [0], [0], [1], [0, 0, 1, 1], [], []>, precision = #tpu.contract_precision<fp32>} : vector<8x64xf32>, vector<64x128xf32>, vector<8x128xf32> -> vector<8x128xf32>
    %cst_3 = arith.constant 11.3137083 : f32
    %8 = vector.broadcast %cst_3 : f32 to vector<8x128xf32>
    %9 = arith.mulf %7, %8 : vector<8x128xf32>
    %c0_4 = arith.constant 0 : index
    %c0_5 = arith.constant 0 : index
    %10 = vector.load %arg3[%c0_4, %c0_5] : memref<8x128xf32, #tpu.memory_space<vmem>>, vector<8x128xf32>
    tpu.vector_store %arg3[%c0_4, %c0_5], %9 {strides = array<i32>} : memref<8x128xf32, #tpu.memory_space<vmem>>, vector<8x128xf32>,
    return
  }
  func.func @transform_0(%arg0: i32) -> (i32, i32) {
    %c0_i32 = arith.constant 0 : i32
    %c0_i32_0 = arith.constant 0 : i32
    return %arg0, %c0_i32 : i32, i32
  }
  func.func @transform_1(%arg0: i32) -> (i32, i32) {
    %c0_i32 = arith.constant 0 : i32
    %c0_i32_0 = arith.constant 0 : i32
    %c0_i32_1 = arith.constant 0 : i32
    return %c0_i32, %c0_i32_0 : i32, i32
  }
  func.func @transform_2(%arg0: i32) -> (i32, i32) {
    %c0_i32 = arith.constant 0 : i32
    %c0_i32_0 = arith.constant 0 : i32
    return %arg0, %c0_i32 : i32, i32
  }
}

</mosaic_0001>

<bundles_post_ra>
// kernel: tpu_custom_call.1
= control target key start
LH: loop header
LB: loop body
LE: loop exit
PB: predicated region body
PF: predicated region fallthrough
CT: control target
= control target key end

     0   :  { %7 = vsyncpa [#allocation3], 0  ;;  %s1476_s0 = inlined_call_operand.vmem [shape: s32[24,1], index: 0, kind: input, shape index: {}]   ;;  %s1477_s1 = inlined_call_operand.hbm [shape: f32[64,128], index: 1, kind: input, shape index: {}]   ;;  %s1478_s2 = inlined_call_operand.hbm [shape: f32[24,128], index: 2, kind: output, shape index: {}]  }
   0x1   :  { %8 = vsyncpa [#allocation4], 0 }
   0x2   :  { %10 = vsyncpa [#allocation4 + $0x1], 0  ;;  %s1240_s9 = smov 0   ;;  %s1242_s10 = smov 0  }
   0x3   :  { %s1244_s11 = smov 0   ;;  %s1246_s12 = smov 0  }
   0x4 LB: > { %s1261_s13 = sadd.s32 4294967295, %s1215_s12   ;;  %s799_s14 = sadd.s32 4294967294, %s1215_s12   ;;  %s1215_s12 = sphi %s1246_s12, %s1494_s12   ;;  %s1211_s11 = sphi %s1244_s11, %s1493_s11   ;;  %s1207_s10 = sphi %s1242_s10, %s1492_s10   ;;  %s1203_s9 = sphi %s1240_s9, %s1491_s9  }
   0x5   : > { %s1265_s15 = sadd.s32 1, %s1215_s12   ;;  %s70_s16 = sadd.s32 1, %s1211_s11 }
   0x6   : > { %s67_s17 = ssub.s32 %s1215_s12, %s1265_s15  ;;  %p80_p0 = scmp.ne.s32.totalorder %s1211_s11, %s1207_s10 }
   0x7   : > { %p68_p1 = scmp.eq.s32.totalorder %s67_s17, 0  ;;  %p81_p2 = scmp.eq.s32.totalorder %s1261_s13, 2 }
   0x8   : > { %p86_p3 = scmp.ne.s32.totalorder %s1207_s10, %s1203_s9  ;;  %p87_p4 = scmp.eq.s32.totalorder %s799_s14, 2 }
   0x9   : > { %s1276_s18 = scalar_select %p68_p1, %s1211_s11, %s70_s16  }
   0xa   : > { %p1278_p5 = por %p81_p2, %p80_p0  ;;  %p1282_p6 = por %p87_p4, %p86_p3 }
   0xb   : > { %p800_p7 = scmp.ge.s32.totalorder %s1215_s12, 1  ;;  %p94_p8 = scmp.lt.s32.totalorder %s1215_s12, 4 }
   0xc   : > { %s1482_s19 = scalar_select %p1278_p5, 1, 0 }
   0xd   : > { %s1483_s20 = scalar_select %p1282_p6, 1, 0 }
   0xe   : > { %p1479_p9 = scmp.eq.s32.totalorder %s1261_s13, 0  ;;  %p1289_p10 = pnand %p800_p7, %p94_p8 }
   0xf   : > { %s1217_s22 = smov [#allocation2]   ;;  %s1121_s27 = scalar_lea.hbm %s1477_s1, 1024 }
  0x10   : > { %s1484_s21 = scalar_select %p1289_p10, 1, 0 }
  0x11   : > { %s106_s23 = sshll.u32 %s1217_s22, 4  ;;  %p1070_p11 = pneg %p1289_p10  ;;  %s107_s23 = int_to_ptr.vmem [resolvable:$true] %s106_s23 }
  0x12   : > { %p1122_p13 = scmp.ne.s32.totalorder %s1477_s1, %s1121_s27  ;;  %p1128_p3 = scmp.lt.u32.totalorder %s1121_s27, %s1477_s1 }
  0x13   : > { %p1297_p12 = pnand %p1479_p9, %p1070_p11 }
  0x15   : > { %p1123_p0 = pneg %p1297_p12 }
  0x17   : > { %p1124_p1 = pnand %p1123_p0, %p1122_p13 }
  0x19   : > { %p1125_p2 = pneg %p1124_p1 }
  0x1b   : > { %p1130_p4 = pnand %p1128_p3, %p1125_p2 }
  0x1d   : > { %1133 = shalt.err (!%p1130_p4)
}
  0x1e   : > { %s1134_s4 = scalar_lea.vmem %s107_s23, 1024  ;;  %p1142_p9 = scmp.lt.s32.totalorder %s107_s23, %s107_s23 }
  0x1f   : > { %p1135_p7 = scmp.ne.s32.totalorder %s107_s23, %s1134_s4  ;;  %p1143_p6 = scmp.lt.s32.totalorder %s1134_s4, %s1134_s4 }
  0x21   : > { %p1137_p8 = pnand %p1135_p7, %p1123_p0  ;;  %p1144_p5 = por %p1143_p6, %p1142_p9 }
  0x23   : > { %p1138_p11 = pneg %p1137_p8 }
  0x25   : > { %p1145_p10 = pnand %p1144_p5, %p1138_p11 }
  0x27   : > { %1148 = shalt.err (!%p1145_p10)
}
  0x28   : > { %s1218_s5 = smov 128   ;;  %s1219_s6 = smov 8  }
  0x29   : > { %1073 = dma.hbm_to_vmem [thread:$0]  (!%p1297_p12), %s1477_s1, 1024, %s107_s23, [#allocation3], %s1218_s5, %s1218_s5, %s1219_s6  }
  0x2a   : > { %p1486_p13 = scmp.ne.s32.totalorder %s1484_s21, 0 }
  0x2b   : > { %p1487_p1 = scmp.eq.s32.totalorder (!%p1486_p13), %s1261_s13, 0 }
  0x2c   : > { %129 = sbr.rel (%p1486_p13) target bundleno = 460 (0x1cc), region = 28 }
  0x33   : > { %1194 = dma.done.wait (%p1487_p1), [#allocation3], 1024   ;;  %p1488_p0 = pmov %p1487_p1 }
  0x34   : > { %p150_p5 = scmp.lt.s32.totalorder %s1261_s13, 2  ;;  %v1220_v0 = vmov 0   ;;  %v1221_v1 = vmov 0.0|0.0   ;;  %v163_v3 = vld [vmem:[#allocation2] sm:$0xff]  ;;  %v164_v4 = vld [vmem:[#allocation2 + $0x8] sm:$0xff]  ;;  %v165_v7 = vld [vmem:[#allocation2 + $0x10] sm:$0xff] }
  0x35   : > { %1196 = vsyncadd (%p1488_p0), [#allocation3], 4294966272  ;;  %1120 = vset.pattern.permute.xlu0 %v1220_v0  ;;  %1019 = vmatprep.subr.bf16.mxu0 %v1221_v1  ;;  %v176_v5 = vand.u32 4294901760, %v163_v3  ;;  %v179_v6 = vand.u32 4294901760, %v164_v4  ;;  %v166_v8 = vld [vmem:[#allocation2 + $0x18] sm:$0xff]  ;;  %v167_v9 = vld [vmem:[#allocation2 + $0x20] sm:$0xff] }
  0x36   : > { %s151_s14 = scalar_select %p150_p5, %s1261_s13, 2  ;;  %983 = vmatprep.subr.bf16.mxu1 %v1221_v1  ;;  %v182_v10 = vand.u32 4294901760, %v165_v7  ;;  %v185_v11 = vand.u32 4294901760, %v166_v8  ;;  %v168_v12 = vld [vmem:[#allocation2 + $0x28] sm:$0xff]  ;;  %v188_v13 = vand.u32 4294901760, %v167_v9  ;;  %v169_v14 = vld [vmem:[#allocation2 + $0x30] sm:$0xff] }
  0x37   : > { %v170_v15 = vld [vmem:[#allocation2 + $0x38] sm:$0xff]  ;;  %v1330_v16 = vpack.c.bf16 %v179_v6, %v176_v5  ;;  %v1332_v17 = vsub.f32 %v163_v3, %v176_v5  ;;  %v1334_v18 = vsub.f32 %v164_v4, %v179_v6  ;;  %v191_v19 = vand.u32 4294901760, %v168_v12  ;;  %s147_s23 = sand.u32 1, %s1207_s10   ;;  %s812_s25 = sshll.u32 %s1261_s13, 7 }
  0x38   : > { %s806_s16 = sshll.u32 %s151_s14, 3  ;;  %v1336_v20 = vsub.f32 %v165_v7, %v182_v10  ;;  %v1338_v21 = vsub.f32 %v166_v8, %v185_v11  ;;  %v1340_v22 = vsub.f32 %v167_v9, %v188_v13  ;;  %v1344_v23 = vpack.c.bf16 %v185_v11, %v182_v10  ;;  %s805_s24 = sshll.u32 %s147_s23, 3 }
  0x39   : > { %s153_s22 = scalar_lea.vmem %s1476_s0, %s806_s16  ;;  %1021 = vmatpush3.bf16.msra.mxu0 %v1330_v16  ;;  %985 = vmatpush3.bf16.msra.mxu1 %v1330_v16  ;;  %v1346_v24 = vsub.f32 %v168_v12, %v191_v19  ;;  %v194_v25 = vand.u32 4294901760, %v169_v14  ;;  %v197_v26 = vand.u32 4294901760, %v170_v15  ;;  %v261_v27 = vand.u32 4294901760, %v1332_v17  ;;  %s149_s26 = scalar_lea.vmem [#allocation5], %s805_s24 }
  0x3a   : > { %v154_v2 = vld [vmem:[%s153_s22] sm:$0xff]  ;;  %1022 = vmatprep.subr.bf16.mxu0 %v1221_v1  ;;  %986 = vmatprep.subr.bf16.mxu1 %v1221_v1  ;;  %v268_v28 = vand.u32 4294901760, %v1334_v18  ;;  %vm1222_vm0 = vmmov 0   ;;  %v1223_v31 = vmov 0.0   ;;  %v1364_v35 = vpack.c.bf16 %v191_v19, %v188_v13  ;;  %s728_s27 = sshll.u32 %s149_s26, 4  ;;  %s1434_s30 = scalar_lea.hbm %s1478_s2, %s812_s25  ;;  %s1436_s27 = int_to_ptr.vmem [resolvable:$true] %s728_s27 }
  0x3b   : > { %158 = vperm.xlu0 %1120, %v154_v2   ;;  %v1352_v29 = vsub.f32 %v169_v14, %v194_v25  ;;  %v1354_v30 = vsub.f32 %v170_v15, %v197_v26  ;;  %942 = vmatprep.mubr.msk.f32.mxu0 %vm1222_vm0, %v1223_v31  ;;  %v262_v33 = vsub.f32 %v1332_v17, %v261_v27  ;;  %v275_v36 = vand.u32 4294901760, %v1336_v20  ;;  %s715_s3 = scalar_lea.sflag [#allocation4], %s147_s23  ;;  %s1149_s4 = scalar_lea.vmem %s1436_s27, 128 }
  0x3c   : > { %885 = vmatprep.mubr.msk.f32.mxu1 %vm1222_vm0, %v1223_v31  ;;  %v1032_v32 = vpack.c.bf16 %v268_v28, %v261_v27  ;;  %v269_v34 = vsub.f32 %v1334_v18, %v268_v28  ;;  %v282_v37 = vand.u32 4294901760, %v1338_v21  ;;  %v1372_v43 = vpack.c.bf16 %v197_v26, %v194_v25  ;;  %p1150_p6 = scmp.ne.s32.totalorder %s1436_s27, %s1149_s4  ;;  %p1489_p9 = scmp.ne.s32.totalorder %s1482_s19, 0 }
  0x3d   : > { %1024 = vmatpush3.bf16.msra.mxu0 %v1344_v23  ;;  %988 = vmatpush3.bf16.msra.mxu1 %v1344_v23  ;;  %v263_v38 = vand.u32 4294901760, %v262_v33  ;;  %v276_v41 = vsub.f32 %v1336_v20, %v275_v36  ;;  %v289_v47 = vand.u32 4294901760, %v1340_v22  ;;  %v296_v48 = vand.u32 4294901760, %v1346_v24  ;;  %s1224_s13 = smov [#allocation5]  }
  0x3e   : > { %1025 = vmatprep.subr.bf16.mxu0 %v1221_v1  ;;  %989 = vmatprep.subr.bf16.mxu1 %v1221_v1  ;;  %v270_v39 = vand.u32 4294901760, %v269_v34  ;;  %v1035_v40 = vpack.c.bf16 %v282_v37, %v275_v36  ;;  %v283_v42 = vsub.f32 %v1338_v21, %v282_v37  ;;  %v303_v55 = vand.u32 4294901760, %v1352_v29  ;;  %p1151_p10 = pnand %p1150_p6, %p1489_p9  ;;  %s1153_s5 = sshll.u32 %s1224_s13, 4  ;;  %s1154_s5 = int_to_ptr.vmem [resolvable:$false] %s1153_s5 }
  0x3f   : > { %v277_v45 = vand.u32 4294901760, %v276_v41  ;;  %v1038_v50 = vpack.c.bf16 %v296_v48, %v289_v47  ;;  %v290_v51 = vsub.f32 %v1340_v22, %v289_v47  ;;  %v297_v52 = vsub.f32 %v1346_v24, %v296_v48  ;;  %s1155_s6 = scalar_lea.vmem %s1154_s5, 256  ;;  %p1156_p2 = scmp.lt.s32.totalorder %s1436_s27, %s1154_s5 }
  0x40   : > { %v996_v44 = vpack.c.bf16 %v270_v39, %v263_v38  ;;  %v284_v46 = vand.u32 4294901760, %v283_v42  ;;  %v310_v56 = vand.u32 4294901760, %v1354_v30  ;;  %v304_v59 = vsub.f32 %v1352_v29, %v303_v55  ;;  %p1152_p12 = pneg %p1151_p10  ;;  %p1157_p3 = scmp.lt.s32.totalorder %s1155_s6, %s1149_s4 }
  0x41   : > { %1027 = vmatpush3.bf16.msra.mxu0 %v1364_v35  ;;  %991 = vmatpush3.bf16.msra.mxu1 %v1364_v35  ;;  %v291_v53 = vand.u32 4294901760, %v290_v51  ;;  %v298_v54 = vand.u32 4294901760, %v297_v52  ;;  %v1008_v0 = vpack.c.bf16 %v1334_v18, %v1332_v17  ;;  %v1011_v2 = vpack.c.bf16 %v1338_v21, %v1336_v20 }
  0x42   : > { %1028 = vmatprep.subr.bf16.mxu0 %v1221_v1  ;;  %992 = vmatprep.subr.bf16.mxu1 %v1221_v1  ;;  %v999_v49 = vpack.c.bf16 %v284_v46, %v277_v45  ;;  %v1041_v58 = vpack.c.bf16 %v310_v56, %v303_v55  ;;  %v311_v60 = vsub.f32 %v1354_v30, %v310_v56  ;;  %v305_v61 = vand.u32 4294901760, %v304_v59  ;;  %p1158_p4 = por %p1157_p3, %p1156_p2 }
  0x43   : > { %v1002_v57 = vpack.c.bf16 %v298_v54, %v291_v53  ;;  %v1014_v3 = vpack.c.bf16 %v1346_v24, %v1340_v22  ;;  %v1017_v4 = vpack.c.bf16 %v1354_v30, %v1352_v29  ;;  %v155_v5 = vlaneseq }
  0x44   : > { %v312_v62 = vand.u32 4294901760, %v311_v60  ;;  %vm171_vm1 = vcmask 523264   ;;  %p1159_p7 = pnand %p1158_p4, %p1152_p12 }
  0x45   : > { %1030 = vmatpush3.bf16.msra.mxu0 %v1372_v43  ;;  %994 = vmatpush3.bf16.msra.mxu1 %v1372_v43  ;;  %v156_v6 = vand.u32 127, %v155_v5 }
  0x46   : > { %1031 = vmatprep.subr.bf16.mxu0 %v1221_v1  ;;  %995 = vmatprep.subr.bf16.mxu1 %v1221_v1  ;;  %v1005_v63 = vpack.c.bf16 %v312_v62, %v305_v61 }
  0xba   : > { %v159_v7 = vpop.permute.xlu0 %158 }
  0xbb   : > { %vm160_vm2 = vcmp.eq.s32.totalorder %v159_v7, %v156_v6 }
  0xbc   : > { %v807_v8 = vsel %vm160_vm2, 1.0, %v1223_v31 }
  0xbd   : > { %v173_v9 = vsel %vm171_vm1, %v807_v8, 0 }
  0xbe   : > { %v249_v10 = vsub.f32 %v173_v9, %v173_v9 }
  0xc0   : > { %v250_v11 = vand.u32 4294901760, %v249_v10 }
  0xc2   : > { %943 = vmatmul.mubr.f32.vlgmr.msra.gmra.mrb[0].mxu0 %v250_v11  ;;  %v251_v12 = vsub.f32 %v249_v10, %v250_v11 }
  0xc3   : > { %1033 = vmatpush3.bf16.msra.mxu0 %v1032_v32  ;;  %961 = vmatprep.mubr.msk.f32.mxu0 %vm1222_vm0, %v1223_v31 }
  0xc4   : > { %1034 = vmatprep.subr.bf16.mxu0 %v1221_v1  ;;  %v252_v13 = vand.u32 4294901760, %v251_v12 }
  0xc6   : > { %886 = vmatmul.mubr.f32.vlgmr.msra.gmra.mrb[0].mxu1 %v252_v13 }
  0xc7   : > { %997 = vmatpush3.bf16.msra.mxu1 %v996_v44  ;;  %1036 = vmatpush3.bf16.msra.mxu0 %v1035_v40 }
  0xc8   : > { %998 = vmatprep.subr.bf16.mxu1 %v1221_v1  ;;  %1037 = vmatprep.subr.bf16.mxu0 %v1221_v1 }
  0xc9   : > { %904 = vmatprep.mubr.msk.f32.mxu1 %vm1222_vm0, %v1223_v31 }
  0xcb   : > { %1000 = vmatpush3.bf16.msra.mxu1 %v999_v49  ;;  %1039 = vmatpush3.bf16.msra.mxu0 %v1038_v50 }
  0xcc   : > { %1001 = vmatprep.subr.bf16.mxu1 %v1221_v1  ;;  %1040 = vmatprep.subr.bf16.mxu0 %v1221_v1 }
  0xcf   : > { %1003 = vmatpush3.bf16.msra.mxu1 %v1002_v57  ;;  %1042 = vmatpush3.bf16.msra.mxu0 %v1041_v58 }
  0xd0   : > { %1004 = vmatprep.subr.bf16.mxu1 %v1221_v1  ;;  %1043 = vmatprep.subr.bf16.mxu0 %v1221_v1 }
  0xd2   : > { %962 = vmatmul.mubr.msk.f32.vlgmr.msra.gmra.mrb[0].mxu0 %vm171_vm1, %v807_v8 }
  0xd3   : > { %1006 = vmatpush3.bf16.msra.mxu1 %v1005_v63  ;;  %1045 = vmatpush3.bf16.msra.mxu0 %v1330_v16 }
  0xd4   : > { %1007 = vmatprep.subr.bf16.mxu1 %v1221_v1  ;;  %1046 = vmatprep.subr.bf16.mxu0 %v1221_v1 }
  0xd5   : > { %980 = vmatprep.mubr.msk.f32.mxu0 %vm1222_vm0, %v1223_v31 }
  0xd6   : > { %905 = vmatmul.mubr.msk.f32.vlgmr.msra.gmra.mrb[0].mxu1 %vm171_vm1, %v807_v8 }
  0xd7   : > { %1009 = vmatpush3.bf16.msra.mxu1 %v1008_v0  ;;  %1048 = vmatpush3.bf16.msra.mxu0 %v1344_v23 }
  0xd8   : > { %1010 = vmatprep.subr.bf16.mxu1 %v1221_v1  ;;  %1049 = vmatprep.subr.bf16.mxu0 %v1221_v1 }
  0xd9   : > { %923 = vmatprep.mubr.msk.f32.mxu1 %vm1222_vm0, %v1223_v31 }
  0xdb   : > { %1012 = vmatpush3.bf16.msra.mxu1 %v1011_v2  ;;  %1051 = vmatpush3.bf16.msra.mxu0 %v1364_v35 }
  0xdc   : > { %1013 = vmatprep.subr.bf16.mxu1 %v1221_v1  ;;  %1052 = vmatprep.subr.bf16.mxu0 %v1221_v1 }
  0xdf   : > { %1015 = vmatpush3.bf16.msra.mxu1 %v1014_v3  ;;  %1054 = vmatpush3.bf16.msra.mxu0 %v1372_v43 }
  0xe0   : > { %1016 = vmatprep.subr.bf16.mxu1 %v1221_v1 }
  0xe2   : > { %981 = vmatmul.mubr.msk.f32.vlgmr.msra.gmra.mrb[0].mxu0 %vm171_vm1, %v807_v8 }
  0xe3   : > { %1018 = vmatpush3.bf16.msra.mxu1 %v1017_v4 }
  0xe6   : > { %924 = vmatmul.mubr.f32.vlgmr.msra.gmra.mrb[0].mxu1 %v249_v10 }
 0x1b5   : > { %v708_v14 = vpop.f32.mrb[0].mxu0 }
 0x1b6   : > { %v982_v15 = vpop.f32.mrb[1].mxu0 }
 0x1b9   : > { %v453_v16 = vpop.f32.mrb[0].mxu1 }
 0x1ba   : > { %v1055_v17 = vadd.f32 %v708_v14, %v453_v16  ;;  %v925_v18 = vpop.f32.mrb[1].mxu1 }
 0x1bc   : > { %v712_v19 = vmul.f32 11.313708, %v1055_v17 }
 0x1be   : > { %713 = vst [vmem:[%s149_s26] sm:$0xff] %v712_v19 }
 0x1bf   : > { %1162 = shalt.err (!%p1159_p7)
}
 0x1c0   : > { %s1163_s7 = scalar_lea.hbm %s1434_s30, 128  ;;  %s1167_s16 = scalar_lea.hbm %s1478_s2, 384 }
 0x1c1   : > { %p1164_p8 = scmp.ne.s32.totalorder %s1434_s30, %s1163_s7  ;;  %p1168_p1 = scmp.lt.u32.totalorder %s1434_s30, %s1478_s2 }
 0x1c2   : > { %p1169_p0 = scmp.lt.u32.totalorder %s1167_s16, %s1163_s7  ;;  %p1171_p6 = scmp.lt.u32.totalorder %s1163_s7, %s1434_s30 }
 0x1c3   : > { %p1165_p11 = pnand %p1164_p8, %p1489_p9 }
 0x1c4   : > { %p1170_p5 = por %p1169_p0, %p1168_p1 }
 0x1c5   : > { %p1166_p13 = pneg %p1165_p11 }
 0x1c6   : > { %p1172_p10 = por %p1171_p6, %p1170_p5 }
 0x1c8   : > { %p1173_p12 = pnand %p1172_p10, %p1166_p13 }
 0x1ca   : > { %1176 = shalt.err (!%p1173_p12)
}
 0x1cb   : > { %1068 = dma.vmem_to_hbm [thread:$0]  (%p1489_p9), %s1436_s27, 128, %s1434_s30, %s715_s3  }
 0x1cc PF: > { %p1080_p2 = scmp.ge.s32.totalorder %s1215_s12, 2  ;;  %s740_s22 = sand.u32 1, %s1203_s9  }
 0x1cd   : > { %p1490_p3 = scmp.ne.s32.totalorder %s1483_s20, 0  ;;  %s741_s23 = scalar_lea.sflag [#allocation4], %s740_s22 }
 0x1cf   : > { %p1075_p4 = pnand %p1080_p2, %p1490_p3 }
 0x1d1   : > { %1198 = dma.done.wait (!%p1075_p4), %s741_s23, 128  }
 0x1d2   : > { %1200 = vsyncadd (!%p1075_p4), %s741_s23, 4294967168  ;;  %p13_p7 = scmp.ge.s32.totalorder %s1265_s15, 5   ;;  %s1491_s9 = smov %s1207_s10 }
 0x1d3   : > { %s1492_s10 = smov %s1211_s11  ;;  %s1493_s11 = smov %s1276_s18 }
 0x1d4   : > { %s1494_s12 = smov %s1265_s15  ;;  %15 = sbr.rel (!%p13_p7) target bundleno = 4 (0x4), region = 68 }
 0x1db   :  { %746 = vsyncpa [#allocation3], 1 }
 0x1dc   :  { %748 = vsyncpa [#allocation3 + $0x1], 1 }
 0x1dd   :  { %749 = vsyncpa [#allocation4], 1 }
 0x1de   :  { %751 = vsyncpa [#allocation4 + $0x1], 1 }

// kernel: tpu_custom_call.1
= control target key start
LH: loop header
LB: loop body
LE: loop exit
PB: predicated region body
PF: predicated region fallthrough
CT: control target
= control target key end

     0   :  { %7 = vsyncpa [#allocation3], 0  ;;  %s1476_s0 = inlined_call_operand.vmem [shape: s32[24,1], index: 0, kind: input, shape index: {}]   ;;  %s1477_s1 = inlined_call_operand.hbm [shape: f32[64,128], index: 1, kind: input, shape index: {}]   ;;  %s1478_s2 = inlined_call_operand.hbm [shape: f32[24,128], index: 2, kind: output, shape index: {}]  }
   0x1   :  { %8 = vsyncpa [#allocation4], 0 }
   0x2   :  { %10 = vsyncpa [#allocation4 + $0x1], 0  ;;  %s1240_s9 = smov 0   ;;  %s1242_s10 = smov 0  }
   0x3   :  { %s1244_s11 = smov 0   ;;  %s1246_s12 = smov 0  }
   0x4 LB: > { %s1261_s13 = sadd.s32 4294967295, %s1215_s12   ;;  %s799_s14 = sadd.s32 4294967294, %s1215_s12   ;;  %s1215_s12 = sphi %s1246_s12, %s1494_s12   ;;  %s1211_s11 = sphi %s1244_s11, %s1493_s11   ;;  %s1207_s10 = sphi %s1242_s10, %s1492_s10   ;;  %s1203_s9 = sphi %s1240_s9, %s1491_s9  }
   0x5   : > { %s1265_s15 = sadd.s32 1, %s1215_s12   ;;  %s70_s16 = sadd.s32 1, %s1211_s11 }
   0x6   : > { %s67_s17 = ssub.s32 %s1215_s12, %s1265_s15  ;;  %p80_p0 = scmp.ne.s32.totalorder %s1211_s11, %s1207_s10 }
   0x7   : > { %p68_p1 = scmp.eq.s32.totalorder %s67_s17, 0  ;;  %p81_p2 = scmp.eq.s32.totalorder %s1261_s13, 2 }
   0x8   : > { %p86_p3 = scmp.ne.s32.totalorder %s1207_s10, %s1203_s9  ;;  %p87_p4 = scmp.eq.s32.totalorder %s799_s14, 2 }
   0x9   : > { %s1276_s18 = scalar_select %p68_p1, %s1211_s11, %s70_s16  }
   0xa   : > { %p1278_p5 = por %p81_p2, %p80_p0  ;;  %p1282_p6 = por %p87_p4, %p86_p3 }
   0xb   : > { %p800_p7 = scmp.ge.s32.totalorder %s1215_s12, 1  ;;  %p94_p8 = scmp.lt.s32.totalorder %s1215_s12, 4 }
   0xc   : > { %s1482_s19 = scalar_select %p1278_p5, 1, 0 }
   0xd   : > { %s1483_s20 = scalar_select %p1282_p6, 1, 0 }
   0xe   : > { %p1479_p9 = scmp.eq.s32.totalorder %s1261_s13, 0  ;;  %p1289_p10 = pnand %p800_p7, %p94_p8 }
   0xf   : > { %s1217_s22 = smov [#allocation2]   ;;  %s1121_s27 = scalar_lea.hbm %s1477_s1, 1024 }
  0x10   : > { %s1484_s21 = scalar_select %p1289_p10, 1, 0 }
  0x11   : > { %s106_s23 = sshll.u32 %s1217_s22, 4  ;;  %p1070_p11 = pneg %p1289_p10  ;;  %s107_s23 = int_to_ptr.vmem [resolvable:$true] %s106_s23 }
  0x12   : > { %p1122_p13 = scmp.ne.s32.totalorder %s1477_s1, %s1121_s27  ;;  %p1128_p3 = scmp.lt.u32.totalorder %s1121_s27, %s1477_s1 }
  0x13   : > { %p1297_p12 = pnand %p1479_p9, %p1070_p11 }
  0x15   : > { %p1123_p0 = pneg %p1297_p12 }
  0x17   : > { %p1124_p1 = pnand %p1123_p0, %p1122_p13 }
  0x19   : > { %p1125_p2 = pneg %p1124_p1 }
  0x1b   : > { %p1130_p4 = pnand %p1128_p3, %p1125_p2 }
  0x1d   : > { %1133 = shalt.err (!%p1130_p4)
}
  0x1e   : > { %s1134_s4 = scalar_lea.vmem %s107_s23, 1024  ;;  %p1142_p9 = scmp.lt.s32.totalorder %s107_s23, %s107_s23 }
  0x1f   : > { %p1135_p7 = scmp.ne.s32.totalorder %s107_s23, %s1134_s4  ;;  %p1143_p6 = scmp.lt.s32.totalorder %s1134_s4, %s1134_s4 }
  0x21   : > { %p1137_p8 = pnand %p1135_p7, %p1123_p0  ;;  %p1144_p5 = por %p1143_p6, %p1142_p9 }
  0x23   : > { %p1138_p11 = pneg %p1137_p8 }
  0x25   : > { %p1145_p10 = pnand %p1144_p5, %p1138_p11 }
  0x27   : > { %1148 = shalt.err (!%p1145_p10)
}
  0x28   : > { %s1218_s5 = smov 128   ;;  %s1219_s6 = smov 8  }
  0x29   : > { %1073 = dma.hbm_to_vmem [thread:$0]  (!%p1297_p12), %s1477_s1, 1024, %s107_s23, [#allocation3], %s1218_s5, %s1218_s5, %s1219_s6  }
  0x2a   : > { %p1486_p13 = scmp.ne.s32.totalorder %s1484_s21, 0 }
  0x2b   : > { %p1487_p1 = scmp.eq.s32.totalorder (!%p1486_p13), %s1261_s13, 0 }
  0x2c   : > { %129 = sbr.rel (%p1486_p13) target bundleno = 460 (0x1cc), region = 28 }
  0x33   : > { %1194 = dma.done.wait (%p1487_p1), [#allocation3], 1024   ;;  %p1488_p0 = pmov %p1487_p1 }
  0x34   : > { %p150_p5 = scmp.lt.s32.totalorder %s1261_s13, 2  ;;  %v1220_v0 = vmov 0   ;;  %v1221_v1 = vmov 0.0|0.0   ;;  %v163_v3 = vld [vmem:[#allocation2] sm:$0xff]  ;;  %v164_v4 = vld [vmem:[#allocation2 + $0x8] sm:$0xff]  ;;  %v165_v7 = vld [vmem:[#allocation2 + $0x10] sm:$0xff] }
  0x35   : > { %1196 = vsyncadd (%p1488_p0), [#allocation3], 4294966272  ;;  %1120 = vset.pattern.permute.xlu0 %v1220_v0  ;;  %1019 = vmatprep.subr.bf16.mxu0 %v1221_v1  ;;  %v176_v5 = vand.u32 4294901760, %v163_v3  ;;  %v179_v6 = vand.u32 4294901760, %v164_v4  ;;  %v166_v8 = vld [vmem:[#allocation2 + $0x18] sm:$0xff]  ;;  %v167_v9 = vld [vmem:[#allocation2 + $0x20] sm:$0xff] }
  0x36   : > { %s151_s14 = scalar_select %p150_p5, %s1261_s13, 2  ;;  %983 = vmatprep.subr.bf16.mxu1 %v1221_v1  ;;  %v182_v10 = vand.u32 4294901760, %v165_v7  ;;  %v185_v11 = vand.u32 4294901760, %v166_v8  ;;  %v168_v12 = vld [vmem:[#allocation2 + $0x28] sm:$0xff]  ;;  %v188_v13 = vand.u32 4294901760, %v167_v9  ;;  %v169_v14 = vld [vmem:[#allocation2 + $0x30] sm:$0xff] }
  0x37   : > { %v170_v15 = vld [vmem:[#allocation2 + $0x38] sm:$0xff]  ;;  %v1330_v16 = vpack.c.bf16 %v179_v6, %v176_v5  ;;  %v1332_v17 = vsub.f32 %v163_v3, %v176_v5  ;;  %v1334_v18 = vsub.f32 %v164_v4, %v179_v6  ;;  %v191_v19 = vand.u32 4294901760, %v168_v12  ;;  %s147_s23 = sand.u32 1, %s1207_s10   ;;  %s812_s25 = sshll.u32 %s1261_s13, 7 }
  0x38   : > { %s806_s16 = sshll.u32 %s151_s14, 3  ;;  %v1336_v20 = vsub.f32 %v165_v7, %v182_v10  ;;  %v1338_v21 = vsub.f32 %v166_v8, %v185_v11  ;;  %v1340_v22 = vsub.f32 %v167_v9, %v188_v13  ;;  %v1344_v23 = vpack.c.bf16 %v185_v11, %v182_v10  ;;  %s805_s24 = sshll.u32 %s147_s23, 3 }
  0x39   : > { %s153_s22 = scalar_lea.vmem %s1476_s0, %s806_s16  ;;  %1021 = vmatpush3.bf16.msra.mxu0 %v1330_v16  ;;  %985 = vmatpush3.bf16.msra.mxu1 %v1330_v16  ;;  %v1346_v24 = vsub.f32 %v168_v12, %v191_v19  ;;  %v194_v25 = vand.u32 4294901760, %v169_v14  ;;  %v197_v26 = vand.u32 4294901760, %v170_v15  ;;  %v261_v27 = vand.u32 4294901760, %v1332_v17  ;;  %s149_s26 = scalar_lea.vmem [#allocation5], %s805_s24 }
  0x3a   : > { %v154_v2 = vld [vmem:[%s153_s22] sm:$0xff]  ;;  %1022 = vmatprep.subr.bf16.mxu0 %v1221_v1  ;;  %986 = vmatprep.subr.bf16.mxu1 %v1221_v1  ;;  %v268_v28 = vand.u32 4294901760, %v1334_v18  ;;  %vm1222_vm0 = vmmov 0   ;;  %v1223_v31 = vmov 0.0   ;;  %v1364_v35 = vpack.c.bf16 %v191_v19, %v188_v13  ;;  %s728_s27 = sshll.u32 %s149_s26, 4  ;;  %s1434_s30 = scalar_lea.hbm %s1478_s2, %s812_s25  ;;  %s1436_s27 = int_to_ptr.vmem [resolvable:$true] %s728_s27 }
  0x3b   : > { %158 = vperm.xlu0 %1120, %v154_v2   ;;  %v1352_v29 = vsub.f32 %v169_v14, %v194_v25  ;;  %v1354_v30 = vsub.f32 %v170_v15, %v197_v26  ;;  %942 = vmatprep.mubr.msk.f32.mxu0 %vm1222_vm0, %v1223_v31  ;;  %v262_v33 = vsub.f32 %v1332_v17, %v261_v27  ;;  %v275_v36 = vand.u32 4294901760, %v1336_v20  ;;  %s715_s3 = scalar_lea.sflag [#allocation4], %s147_s23  ;;  %s1149_s4 = scalar_lea.vmem %s1436_s27, 128 }
  0x3c   : > { %885 = vmatprep.mubr.msk.f32.mxu1 %vm1222_vm0, %v1223_v31  ;;  %v1032_v32 = vpack.c.bf16 %v268_v28, %v261_v27  ;;  %v269_v34 = vsub.f32 %v1334_v18, %v268_v28  ;;  %v282_v37 = vand.u32 4294901760, %v1338_v21  ;;  %v1372_v43 = vpack.c.bf16 %v197_v26, %v194_v25  ;;  %p1150_p6 = scmp.ne.s32.totalorder %s1436_s27, %s1149_s4  ;;  %p1489_p9 = scmp.ne.s32.totalorder %s1482_s19, 0 }
  0x3d   : > { %1024 = vmatpush3.bf16.msra.mxu0 %v1344_v23  ;;  %988 = vmatpush3.bf16.msra.mxu1 %v1344_v23  ;;  %v263_v38 = vand.u32 4294901760, %v262_v33  ;;  %v276_v41 = vsub.f32 %v1336_v20, %v275_v36  ;;  %v289_v47 = vand.u32 4294901760, %v1340_v22  ;;  %v296_v48 = vand.u32 4294901760, %v1346_v24  ;;  %s1224_s13 = smov [#allocation5]  }
  0x3e   : > { %1025 = vmatprep.subr.bf16.mxu0 %v1221_v1  ;;  %989 = vmatprep.subr.bf16.mxu1 %v1221_v1  ;;  %v270_v39 = vand.u32 4294901760, %v269_v34  ;;  %v1035_v40 = vpack.c.bf16 %v282_v37, %v275_v36  ;;  %v283_v42 = vsub.f32 %v1338_v21, %v282_v37  ;;  %v303_v55 = vand.u32 4294901760, %v1352_v29  ;;  %p1151_p10 = pnand %p1150_p6, %p1489_p9  ;;  %s1153_s5 = sshll.u32 %s1224_s13, 4  ;;  %s1154_s5 = int_to_ptr.vmem [resolvable:$false] %s1153_s5 }
  0x3f   : > { %v277_v45 = vand.u32 4294901760, %v276_v41  ;;  %v1038_v50 = vpack.c.bf16 %v296_v48, %v289_v47  ;;  %v290_v51 = vsub.f32 %v1340_v22, %v289_v47  ;;  %v297_v52 = vsub.f32 %v1346_v24, %v296_v48  ;;  %s1155_s6 = scalar_lea.vmem %s1154_s5, 256  ;;  %p1156_p2 = scmp.lt.s32.totalorder %s1436_s27, %s1154_s5 }
  0x40   : > { %v996_v44 = vpack.c.bf16 %v270_v39, %v263_v38  ;;  %v284_v46 = vand.u32 4294901760, %v283_v42  ;;  %v310_v56 = vand.u32 4294901760, %v1354_v30  ;;  %v304_v59 = vsub.f32 %v1352_v29, %v303_v55  ;;  %p1152_p12 = pneg %p1151_p10  ;;  %p1157_p3 = scmp.lt.s32.totalorder %s1155_s6, %s1149_s4 }
  0x41   : > { %1027 = vmatpush3.bf16.msra.mxu0 %v1364_v35  ;;  %991 = vmatpush3.bf16.msra.mxu1 %v1364_v35  ;;  %v291_v53 = vand.u32 4294901760, %v290_v51  ;;  %v298_v54 = vand.u32 4294901760, %v297_v52  ;;  %v1008_v0 = vpack.c.bf16 %v1334_v18, %v1332_v17  ;;  %v1011_v2 = vpack.c.bf16 %v1338_v21, %v1336_v20 }
  0x42   : > { %1028 = vmatprep.subr.bf16.mxu0 %v1221_v1  ;;  %992 = vmatprep.subr.bf16.mxu1 %v1221_v1  ;;  %v999_v49 = vpack.c.bf16 %v284_v46, %v277_v45  ;;  %v1041_v58 = vpack.c.bf16 %v310_v56, %v303_v55  ;;  %v311_v60 = vsub.f32 %v1354_v30, %v310_v56  ;;  %v305_v61 = vand.u32 4294901760, %v304_v59  ;;  %p1158_p4 = por %p1157_p3, %p1156_p2 }
  0x43   : > { %v1002_v57 = vpack.c.bf16 %v298_v54, %v291_v53  ;;  %v1014_v3 = vpack.c.bf16 %v1346_v24, %v1340_v22  ;;  %v1017_v4 = vpack.c.bf16 %v1354_v30, %v1352_v29  ;;  %v155_v5 = vlaneseq }
  0x44   : > { %v312_v62 = vand.u32 4294901760, %v311_v60  ;;  %vm171_vm1 = vcmask 523264   ;;  %p1159_p7 = pnand %p1158_p4, %p1152_p12 }
  0x45   : > { %1030 = vmatpush3.bf16.msra.mxu0 %v1372_v43  ;;  %994 = vmatpush3.bf16.msra.mxu1 %v1372_v43  ;;  %v156_v6 = vand.u32 127, %v155_v5 }
  0x46   : > { %1031 = vmatprep.subr.bf16.mxu0 %v1221_v1  ;;  %995 = vmatprep.subr.bf16.mxu1 %v1221_v1  ;;  %v1005_v63 = vpack.c.bf16 %v312_v62, %v305_v61 }
  0xba   : > { %v159_v7 = vpop.permute.xlu0 %158 }
  0xbb   : > { %vm160_vm2 = vcmp.eq.s32.totalorder %v159_v7, %v156_v6 }
  0xbc   : > { %v807_v8 = vsel %vm160_vm2, 1.0, %v1223_v31 }
  0xbd   : > { %v173_v9 = vsel %vm171_vm1, %v807_v8, 0 }
  0xbe   : > { %v249_v10 = vsub.f32 %v173_v9, %v173_v9 }
  0xc0   : > { %v250_v11 = vand.u32 4294901760, %v249_v10 }
  0xc2   : > { %943 = vmatmul.mubr.f32.vlgmr.msra.gmra.mrb[0].mxu0 %v250_v11  ;;  %v251_v12 = vsub.f32 %v249_v10, %v250_v11 }
  0xc3   : > { %1033 = vmatpush3.bf16.msra.mxu0 %v1032_v32  ;;  %961 = vmatprep.mubr.msk.f32.mxu0 %vm1222_vm0, %v1223_v31 }
  0xc4   : > { %1034 = vmatprep.subr.bf16.mxu0 %v1221_v1  ;;  %v252_v13 = vand.u32 4294901760, %v251_v12 }
  0xc6   : > { %886 = vmatmul.mubr.f32.vlgmr.msra.gmra.mrb[0].mxu1 %v252_v13 }
  0xc7   : > { %997 = vmatpush3.bf16.msra.mxu1 %v996_v44  ;;  %1036 = vmatpush3.bf16.msra.mxu0 %v1035_v40 }
  0xc8   : > { %998 = vmatprep.subr.bf16.mxu1 %v1221_v1  ;;  %1037 = vmatprep.subr.bf16.mxu0 %v1221_v1 }
  0xc9   : > { %904 = vmatprep.mubr.msk.f32.mxu1 %vm1222_vm0, %v1223_v31 }
  0xcb   : > { %1000 = vmatpush3.bf16.msra.mxu1 %v999_v49  ;;  %1039 = vmatpush3.bf16.msra.mxu0 %v1038_v50 }
  0xcc   : > { %1001 = vmatprep.subr.bf16.mxu1 %v1221_v1  ;;  %1040 = vmatprep.subr.bf16.mxu0 %v1221_v1 }
  0xcf   : > { %1003 = vmatpush3.bf16.msra.mxu1 %v1002_v57  ;;  %1042 = vmatpush3.bf16.msra.mxu0 %v1041_v58 }
  0xd0   : > { %1004 = vmatprep.subr.bf16.mxu1 %v1221_v1  ;;  %1043 = vmatprep.subr.bf16.mxu0 %v1221_v1 }
  0xd2   : > { %962 = vmatmul.mubr.msk.f32.vlgmr.msra.gmra.mrb[0].mxu0 %vm171_vm1, %v807_v8 }
  0xd3   : > { %1006 = vmatpush3.bf16.msra.mxu1 %v1005_v63  ;;  %1045 = vmatpush3.bf16.msra.mxu0 %v1330_v16 }
  0xd4   : > { %1007 = vmatprep.subr.bf16.mxu1 %v1221_v1  ;;  %1046 = vmatprep.subr.bf16.mxu0 %v1221_v1 }
  0xd5   : > { %980 = vmatprep.mubr.msk.f32.mxu0 %vm1222_vm0, %v1223_v31 }
  0xd6   : > { %905 = vmatmul.mubr.msk.f32.vlgmr.msra.gmra.mrb[0].mxu1 %vm171_vm1, %v807_v8 }
  0xd7   : > { %1009 = vmatpush3.bf16.msra.mxu1 %v1008_v0  ;;  %1048 = vmatpush3.bf16.msra.mxu0 %v1344_v23 }
  0xd8   : > { %1010 = vmatprep.subr.bf16.mxu1 %v1221_v1  ;;  %1049 = vmatprep.subr.bf16.mxu0 %v1221_v1 }
  0xd9   : > { %923 = vmatprep.mubr.msk.f32.mxu1 %vm1222_vm0, %v1223_v31 }
  0xdb   : > { %1012 = vmatpush3.bf16.msra.mxu1 %v1011_v2  ;;  %1051 = vmatpush3.bf16.msra.mxu0 %v1364_v35 }
  0xdc   : > { %1013 = vmatprep.subr.bf16.mxu1 %v1221_v1  ;;  %1052 = vmatprep.subr.bf16.mxu0 %v1221_v1 }
  0xdf   : > { %1015 = vmatpush3.bf16.msra.mxu1 %v1014_v3  ;;  %1054 = vmatpush3.bf16.msra.mxu0 %v1372_v43 }
  0xe0   : > { %1016 = vmatprep.subr.bf16.mxu1 %v1221_v1 }
  0xe2   : > { %981 = vmatmul.mubr.msk.f32.vlgmr.msra.gmra.mrb[0].mxu0 %vm171_vm1, %v807_v8 }
  0xe3   : > { %1018 = vmatpush3.bf16.msra.mxu1 %v1017_v4 }
  0xe6   : > { %924 = vmatmul.mubr.f32.vlgmr.msra.gmra.mrb[0].mxu1 %v249_v10 }
 0x1b5   : > { %v708_v14 = vpop.f32.mrb[0].mxu0 }
 0x1b6   : > { %v982_v15 = vpop.f32.mrb[1].mxu0 }
 0x1b9   : > { %v453_v16 = vpop.f32.mrb[0].mxu1 }
 0x1ba   : > { %v1055_v17 = vadd.f32 %v708_v14, %v453_v16  ;;  %v925_v18 = vpop.f32.mrb[1].mxu1 }
 0x1bc   : > { %v712_v19 = vmul.f32 11.313708, %v1055_v17 }
 0x1be   : > { %713 = vst [vmem:[%s149_s26] sm:$0xff] %v712_v19 }
 0x1bf   : > { %1162 = shalt.err (!%p1159_p7)
}
 0x1c0   : > { %s1163_s7 = scalar_lea.hbm %s1434_s30, 128  ;;  %s1167_s16 = scalar_lea.hbm %s1478_s2, 384 }
 0x1c1   : > { %p1164_p8 = scmp.ne.s32.totalorder %s1434_s30, %s1163_s7  ;;  %p1168_p1 = scmp.lt.u32.totalorder %s1434_s30, %s1478_s2 }
 0x1c2   : > { %p1169_p0 = scmp.lt.u32.totalorder %s1167_s16, %s1163_s7  ;;  %p1171_p6 = scmp.lt.u32.totalorder %s1163_s7, %s1434_s30 }
 0x1c3   : > { %p1165_p11 = pnand %p1164_p8, %p1489_p9 }
 0x1c4   : > { %p1170_p5 = por %p1169_p0, %p1168_p1 }
 0x1c5   : > { %p1166_p13 = pneg %p1165_p11 }
 0x1c6   : > { %p1172_p10 = por %p1171_p6, %p1170_p5 }
 0x1c8   : > { %p1173_p12 = pnand %p1172_p10, %p1166_p13 }
 0x1ca   : > { %1176 = shalt.err (!%p1173_p12)
}
 0x1cb   : > { %1068 = dma.vmem_to_hbm [thread:$0]  (%p1489_p9), %s1436_s27, 128, %s1434_s30, %s715_s3  }
 0x1cc PF: > { %p1080_p2 = scmp.ge.s32.totalorder %s1215_s12, 2  ;;  %s740_s22 = sand.u32 1, %s1203_s9  }
 0x1cd   : > { %p1490_p3 = scmp.ne.s32.totalorder %s1483_s20, 0  ;;  %s741_s23 = scalar_lea.sflag [#allocation4], %s740_s22 }
 0x1cf   : > { %p1075_p4 = pnand %p1080_p2, %p1490_p3 }
 0x1d1   : > { %1198 = dma.done.wait (!%p1075_p4), %s741_s23, 128  }
 0x1d2   : > { %1200 = vsyncadd (!%p1075_p4), %s741_s23, 4294967168  ;;  %p13_p7 = scmp.ge.s32.totalorder %s1265_s15, 5   ;;  %s1491_s9 = smov %s1207_s10 }
 0x1d3   : > { %s1492_s10 = smov %s1211_s11  ;;  %s1493_s11 = smov %s1276_s18 }
 0x1d4   : > { %s1494_s12 = smov %s1265_s15  ;;  %15 = sbr.rel (!%p13_p7) target bundleno = 4 (0x4), region = 68 }
 0x1db   :  { %746 = vsyncpa [#allocation3], 1 }
 0x1dc   :  { %748 = vsyncpa [#allocation3 + $0x1], 1 }
 0x1dd   :  { %749 = vsyncpa [#allocation4], 1 }
 0x1de   :  { %751 = vsyncpa [#allocation4 + $0x1], 1 }

</bundles_post_ra>
